<compile_context>
chip_gen: v7x
topology: tpu7x:2x2x1
jax: 0.10.0
libtpu: 0.0.40
codegen_flags: <defaults>
</compile_context>

<pallas_src>
import jax
import jax.numpy as jnp
from jax.experimental import pallas as pl
from jax.experimental.pallas import tpu as pltpu

SLOPE = 0.1


def _convffn_kernel(x_ref, w1_ref, b1_ref, w2_ref, b2_ref, o_ref):
    # x_ref : (C,  TR)   activation tile — channels on sublanes, pixels on lanes
    # w1_ref: (4C, C)    conv weights (PyTorch (out, in) layout), compute dtype
    # b1_ref: (4C, 1)    f32 bias (broadcast along lanes)
    # w2_ref: (C, 2C)    conv_out weights, compute dtype
    # b2_ref: (C, 1)     f32 bias
    x = x_ref[...]
    xc = x.astype(w1_ref.dtype)                 # cast only at the MXU boundary

    # Single merged conv1: one (4C, C) @ (C, TR) MXU pass, bias added once.
    h = jnp.dot(w1_ref[...], xc, preferred_element_type=jnp.float32) + b1_ref[...]

    two_c = w2_ref.shape[1]
    # Gating chain in the compute dtype (no-op cast for f32; halves the
    # (2C, TR) intermediates when the caller picks bf16 on v6e/v7x).
    hg = h.astype(w2_ref.dtype)
    x1 = hg[:two_c]                             # sublane slice at row 2C (free when 8-aligned)
    x2 = hg[two_c:]
    gate = jnp.where(x2 >= 0, x2, SLOPE * x2)   # LeakyReLU(0.1) on the VPU
    hidden = x1 * gate                          # (2C, TR), already in w2's dtype

    y = jnp.dot(w2_ref[...], hidden, preferred_element_type=jnp.float32) + b2_ref[...]
    o_ref[...] = (x.astype(jnp.float32) + y).astype(o_ref.dtype)   # residual add


def _vmem_capacity_bytes():
    try:
        return int(pltpu.get_tpu_info().vmem_capacity_bytes)
    except Exception:
        return 64 << 20     # assume the smallest (v7x per-core) if the query fails


def _pick_tile(hw, c, n_batch, act_bytes, cmp_bytes, *, min_steps=4, cap=4096):
    """Row-tile (lane) width + scoped-VMEM limit, generation aware."""
    vmem_cap = _vmem_capacity_bytes()
    # Working-set budget: <= 24 MiB on 128 MiB parts (v5e/v6e), <= 16 MiB on v7x.
    budget = min(24 << 20, vmem_cap // 4)
    # Bytes per lane column (row tile of width 1 lane):
    #   double-buffered activation tiles (x in + y out)          -> 4*C*act
    #   compute-dtype copies feeding the MXU (xc, x1*gate)       -> 3*C*cmp
    #   f32 intermediates (h:4C, gate:2C, product:2C, y:C, res:C)-> 10*C*4
    per_col = 4 * c * act_bytes + 3 * c * cmp_bytes + 10 * c * 4
    budget_cols = max(128, (budget // max(per_col, 1)) // 128 * 128)

    if hw < 128:
        tr = hw                                 # full-extent lane block
    else:
        tr = min(budget_cols, cap, (hw // 128) * 128)
        # Guarantee >= min_steps grid steps so v7x's two TensorCores both get
        # work and the DMA/compute pipeline has something to overlap.
        if n_batch * pl.cdiv(hw, tr) < min_steps:
            need_j = pl.cdiv(min_steps, max(n_batch, 1))
            cand = max(128, (hw // max(need_j, 1)) // 128 * 128)
            tr = min(tr, cand)

    # Scoped-VMEM limit with headroom for weights + compiler scratch.
    vmem_limit = int(min(vmem_cap // 2, 64 << 20))
    return tr, vmem_limit


def conv_ffn(x_nchw, w1, b1, w2, b2, *, tile_r=None, compute_dtype=None):
    """ConvFFN forward.

    x_nchw : (N, C, H, W)
    w1     : (4C, C)  -- PyTorch conv weight (out, in), 1x1 spatial squeezed
    b1     : (4C,)
    w2     : (C, 2C)  -- PyTorch conv_out weight (out, in)
    b2     : (C,)
    compute_dtype : dtype for the MXU matmuls and gating intermediates
        (e.g. jnp.bfloat16 on v6e/v7x). NOTE: this only changes the in-kernel
        cast; x and the output still stream over HBM at x_nchw.dtype.  To cut
        streamed bytes in the (memory-bound) large-C regime, pass x in bf16.
    """
    N, C, H, W = x_nchw.shape
    HW = H * W
    two_c = w2.shape[1]
    four_c = w1.shape[0]
    cdt = jnp.dtype(compute_dtype) if compute_dtype is not None else x_nchw.dtype

    # Free reshape (no transpose): NCHW -> (N, C, H*W); pixels land on lanes.
    xr = x_nchw.reshape(N, C, HW)

    act_bytes = jnp.dtype(x_nchw.dtype).itemsize
    cmp_bytes = jnp.dtype(cdt).itemsize
    tr_auto, vmem_limit = _pick_tile(HW, C, N, act_bytes, cmp_bytes)
    tr = tile_r if tile_r is not None else tr_auto

    w1c = w1.astype(cdt)
    b1c = b1.reshape(four_c, 1).astype(jnp.float32)
    w2c = w2.astype(cdt)
    b2c = b2.reshape(C, 1).astype(jnp.float32)

    grid = (N, pl.cdiv(HW, tr))

    weight_bytes = (w1c.size + w2c.size) * cmp_bytes + (b1c.size + b2c.size) * 4
    cost = pl.CostEstimate(
        flops=int(2 * N * HW * (four_c * C + C * two_c)),
        transcendentals=0,
        bytes_accessed=int(2 * N * C * HW * act_bytes + weight_bytes),
    )

    y = pl.pallas_call(
        _convffn_kernel,
        out_shape=jax.ShapeDtypeStruct((N, C, HW), x_nchw.dtype),
        grid_spec=pltpu.PrefetchScalarGridSpec(
            num_scalar_prefetch=0,
            grid=grid,
            in_specs=[
                pl.BlockSpec((None, C, tr), lambda n, j: (n, 0, j)),
                pl.BlockSpec((four_c, C), lambda n, j: (0, 0)),
                pl.BlockSpec((four_c, 1), lambda n, j: (0, 0)),
                pl.BlockSpec((C, two_c), lambda n, j: (0, 0)),
                pl.BlockSpec((C, 1), lambda n, j: (0, 0)),
            ],
            out_specs=pl.BlockSpec((None, C, tr), lambda n, j: (n, 0, j)),
        ),
        compiler_params=pltpu.CompilerParams(
            dimension_semantics=("parallel", "parallel"),
            vmem_limit_bytes=vmem_limit),
        cost_estimate=cost,
    )(xr, w1c, b1c, w2c, b2c)

    return y.reshape(N, C, H, W)          # free reshape back to NCHW


def _reference(x_nchw, w1, b1, w2, b2):
    # Pure-JAX reference of the PyTorch forward (1x1 conv == channel matmul).
    N, C, H, W = x_nchw.shape
    xr = x_nchw.reshape(N, C, H * W)
    h = jnp.einsum("oc,ncr->nor", w1, xr) + b1[None, :, None]
    two_c = w2.shape[1]
    x1, x2 = h[:, :two_c], h[:, two_c:]
    gate = jnp.where(x2 >= 0, x2, SLOPE * x2)
    y = jnp.einsum("co,nor->ncr", w2, x1 * gate) + b2[None, :, None]
    return (xr + y).reshape(N, C, H, W)


if __name__ == "__main__":
    in_ch = 4
    expansion_factor = 2
    internal_ch = in_ch * expansion_factor        # 8
    N, H, W = 2, 16, 16

    key = jax.random.PRNGKey(0)
    kx, kw1, kb1, kw2, kb2 = jax.random.split(key, 5)

    x = jax.random.normal(kx, (N, in_ch, H, W), dtype=jnp.float32)
    # Conv weights in PyTorch (out, in) layout with the 1x1 spatial dims dropped.
    w1 = jax.random.normal(kw1, (internal_ch * 2, in_ch), dtype=jnp.float32) * 0.1
    b1 = jax.random.normal(kb1, (internal_ch * 2,), dtype=jnp.float32) * 0.1
    w2 = jax.random.normal(kw2, (in_ch, internal_ch), dtype=jnp.float32) * 0.1
    b2 = jax.random.normal(kb2, (in_ch,), dtype=jnp.float32) * 0.1

    ref = _reference(x, w1, b1, w2, b2)

    out = jax.block_until_ready(jax.jit(conv_ffn)(x, w1, b1, w2, b2))

    assert out.shape == (N, in_ch, H, W)
    assert jnp.allclose(out, ref, atol=1e-5, rtol=1e-5), "mismatch vs reference"

    print("KERNEL_OK")
</pallas_src>

<mosaic_0001>
module attributes {stable_mosaic.version = 11 : i64} {
  func.func @_convffn_kernel(%arg0: i32, %arg1: i32, %arg2: memref<1x4x128xf32, #tpu.memory_space<vmem>>, %arg3: memref<16x4xf32, #tpu.memory_space<vmem>>, %arg4: memref<16x1xf32, #tpu.memory_space<vmem>>, %arg5: memref<4x8xf32, #tpu.memory_space<vmem>>, %arg6: memref<4x1xf32, #tpu.memory_space<vmem>>, %arg7: memref<1x4x128xf32, #tpu.memory_space<vmem>>) attributes {dimension_semantics = [#tpu.dimension_semantics<parallel>, #tpu.dimension_semantics<parallel>], iteration_bounds = array<i64: 2, 2>, scalar_prefetch = 0 : i64, scratch_operands = 0 : i64, tpu.core_type = #tpu.core_type<tc>, window_params = [{transform_indices = @transform_0, window_bounds = array<i64: 1, 4, 128>}, {pipeline_mode = #tpu.pipeline_mode<synchronous>, transform_indices = @transform_1, window_bounds = array<i64: 16, 4>}, {pipeline_mode = #tpu.pipeline_mode<synchronous>, transform_indices = @transform_2, window_bounds = array<i64: 16, 1>}, {pipeline_mode = #tpu.pipeline_mode<synchronous>, transform_indices = @transform_3, window_bounds = array<i64: 4, 8>}, {pipeline_mode = #tpu.pipeline_mode<synchronous>, transform_indices = @transform_4, window_bounds = array<i64: 4, 1>}, {transform_indices = @transform_5, window_bounds = array<i64: 1, 4, 128>}]} {
    %c0 = arith.constant 0 : index
    %c0_0 = arith.constant 0 : index
    %c0_1 = arith.constant 0 : index
    %0 = vector.load %arg2[%c0, %c0_0, %c0_1] : memref<1x4x128xf32, #tpu.memory_space<vmem>>, vector<1x4x128xf32>
    %1 = vector.shape_cast %0 : vector<1x4x128xf32> to vector<4x128xf32>
    %c0_2 = arith.constant 0 : index
    %c0_3 = arith.constant 0 : index
    %2 = vector.load %arg3[%c0_2, %c0_3] : memref<16x4xf32, #tpu.memory_space<vmem>>, vector<16x4xf32>
    %cst = arith.constant dense<0.000000e+00> : vector<16x128xf32>
    %3 = tpu.matmul %2, %1, %cst {dimension_numbers = #tpu.dot_dimension_numbers<[1], [0], [0], [1], [0, 0, 1, 1], [], []>} : vector<16x4xf32>, vector<4x128xf32>, vector<16x128xf32> -> vector<16x128xf32>
    %c0_4 = arith.constant 0 : index
    %c0_5 = arith.constant 0 : index
    %4 = vector.load %arg4[%c0_4, %c0_5] : memref<16x1xf32, #tpu.memory_space<vmem>>, vector<16x1xf32>
    %5 = vector.broadcast %4 : vector<16x1xf32> to vector<16x128xf32>
    %6 = arith.addf %3, %5 : vector<16x128xf32>
    %7 = vector.extract_strided_slice %6 {offsets = [0, 0], sizes = [8, 128], strides = [1, 1]} : vector<16x128xf32> to vector<8x128xf32>
    %8 = vector.extract_strided_slice %6 {offsets = [8, 0], sizes = [8, 128], strides = [1, 1]} : vector<16x128xf32> to vector<8x128xf32>
    %cst_6 = arith.constant 0.000000e+00 : f32
    %9 = vector.broadcast %cst_6 : f32 to vector<8x128xf32>
    %10 = arith.cmpf oge, %8, %9 : vector<8x128xf32>
    %cst_7 = arith.constant 1.000000e-01 : f32
    %11 = vector.broadcast %cst_7 : f32 to vector<8x128xf32>
    %12 = arith.mulf %11, %8 : vector<8x128xf32>
    %13 = arith.select %10, %8, %12 : vector<8x128xi1>, vector<8x128xf32>
    %14 = arith.mulf %7, %13 : vector<8x128xf32>
    %c0_8 = arith.constant 0 : index
    %c0_9 = arith.constant 0 : index
    %15 = vector.load %arg5[%c0_8, %c0_9] : memref<4x8xf32, #tpu.memory_space<vmem>>, vector<4x8xf32>
    %cst_10 = arith.constant dense<0.000000e+00> : vector<4x128xf32>
    %16 = tpu.matmul %15, %14, %cst_10 {dimension_numbers = #tpu.dot_dimension_numbers<[1], [0], [0], [1], [0, 0, 1, 1], [], []>} : vector<4x8xf32>, vector<8x128xf32>, vector<4x128xf32> -> vector<4x128xf32>
    %c0_11 = arith.constant 0 : index
    %c0_12 = arith.constant 0 : index
    %17 = vector.load %arg6[%c0_11, %c0_12] : memref<4x1xf32, #tpu.memory_space<vmem>>, vector<4x1xf32>
    %18 = vector.broadcast %17 : vector<4x1xf32> to vector<4x128xf32>
    %19 = arith.addf %16, %18 : vector<4x128xf32>
    %20 = arith.addf %1, %19 : vector<4x128xf32>
    %c0_13 = arith.constant 0 : index
    %c0_14 = arith.constant 0 : index
    %c0_15 = arith.constant 0 : index
    %21 = vector.load %arg7[%c0_13, %c0_14, %c0_15] : memref<1x4x128xf32, #tpu.memory_space<vmem>>, vector<1x4x128xf32>
    %22 = vector.shape_cast %21 : vector<1x4x128xf32> to vector<4x128xf32>
    %23 = vector.shape_cast %20 : vector<4x128xf32> to vector<1x4x128xf32>
    tpu.vector_store %arg7[%c0_13, %c0_14, %c0_15], %23 {strides = array<i32>} : memref<1x4x128xf32, #tpu.memory_space<vmem>>, vector<1x4x128xf32>,
    return
  }
  func.func @transform_0(%arg0: i32, %arg1: i32) -> (i32, i32, i32) {
    %c0_i32 = arith.constant 0 : i32
    %c0_i32_0 = arith.constant 0 : i32
    return %arg0, %c0_i32, %arg1 : i32, i32, i32
  }
  func.func @transform_1(%arg0: i32, %arg1: i32) -> (i32, i32) {
    %c0_i32 = arith.constant 0 : i32
    %c0_i32_0 = arith.constant 0 : i32
    %c0_i32_1 = arith.constant 0 : i32
    return %c0_i32, %c0_i32_0 : i32, i32
  }
  func.func @transform_2(%arg0: i32, %arg1: i32) -> (i32, i32) {
    %c0_i32 = arith.constant 0 : i32
    %c0_i32_0 = arith.constant 0 : i32
    %c0_i32_1 = arith.constant 0 : i32
    return %c0_i32, %c0_i32_0 : i32, i32
  }
  func.func @transform_3(%arg0: i32, %arg1: i32) -> (i32, i32) {
    %c0_i32 = arith.constant 0 : i32
    %c0_i32_0 = arith.constant 0 : i32
    %c0_i32_1 = arith.constant 0 : i32
    return %c0_i32, %c0_i32_0 : i32, i32
  }
  func.func @transform_4(%arg0: i32, %arg1: i32) -> (i32, i32) {
    %c0_i32 = arith.constant 0 : i32
    %c0_i32_0 = arith.constant 0 : i32
    %c0_i32_1 = arith.constant 0 : i32
    return %c0_i32, %c0_i32_0 : i32, i32
  }
  func.func @transform_5(%arg0: i32, %arg1: i32) -> (i32, i32, i32) {
    %c0_i32 = arith.constant 0 : i32
    %c0_i32_0 = arith.constant 0 : i32
    return %arg0, %c0_i32, %arg1 : i32, i32, i32
  }
}

</mosaic_0001>

<bundles_post_ra>
// kernel: conv_ffn.1
= control target key start
LH: loop header
LB: loop body
LE: loop exit
PB: predicated region body
PF: predicated region fallthrough
CT: control target
= control target key end

     0   :  { %s678_s18 = smov 0   ;;  %s680_s19 = smov 0   ;;  %s756_s0 = inlined_call_operand.vmem [shape: f32[2,4,256], index: 0, kind: input, shape index: {}]   ;;  %s757_s1 = inlined_call_operand.vmem [shape: f32[16,4], index: 1, kind: input, shape index: {}]   ;;  %s758_s2 = inlined_call_operand.vmem [shape: f32[16,1], index: 2, kind: input, shape index: {}]   ;;  %s759_s3 = inlined_call_operand.vmem [shape: f32[4,8], index: 3, kind: input, shape index: {}]   ;;  %s760_s4 = inlined_call_operand.vmem [shape: f32[4,1], index: 4, kind: input, shape index: {}]   ;;  %s761_s5 = inlined_call_operand.vmem [shape: f32[2,4,256], index: 5, kind: output, shape index: {}]  }
   0x1   :  { %s682_s20 = smov 0   ;;  %s684_s21 = smov 0  }
   0x2   :  { %s686_s22 = smov 0  }
   0x3 LB: > { %s24_s23 = sadd.s32 1, %s635_s20  ;;  %s27_s24 = sadd.s32 1, %s639_s21  ;;  %s643_s22 = sphi %s686_s22, %s15_s22   ;;  %s639_s21 = sphi %s684_s21, %s765_s21   ;;  %s635_s20 = sphi %s682_s20, %s764_s20   ;;  %s631_s19 = sphi %s680_s19, %s763_s19   ;;  %s627_s18 = sphi %s678_s18, %s762_s18  }
   0x4   : > { %p25_p0 = scmp.ge.s32.totalorder %s24_s23, 2  ;;  %p534_p1 = scmp.ge.s32.totalorder %s643_s22, 1 }
   0x5   : > { %p206_p2 = scmp.lt.s32.totalorder %s643_s22, 5 }
   0x6   : > { %s767_s23 = smov (%p25_p0, %s24_s23), 0  ;;  %s769_s24 = smov (!%p25_p0, %s27_s24), %s639_s21 }
   0x7   : > { %p207_p3 = pnand %p534_p1, %p206_p2  ;;  %p29_p4 = scmp.ge.s32.totalorder %s769_s24, 2 }
   0x8   : > { %p240_p5 = scmp.lt.s32.totalorder (!%p207_p3), %s631_s19, 1  ;;  %p242_p6 = scmp.lt.s32.totalorder (!%p207_p3), %s627_s18, 1  ;;  %v257_v0 = vld [vmem:[%s757_s1] sm:$0xff] (!%p207_p3)  ;;  %vm271_vm0 = vcmask (!%p207_p3), 31744   ;;  %v260_v1 = vld [vmem:[%s758_s2 + $0x8] sm:$0xff] (!%p207_p3)  ;;  %v645_v2 = vmov (!%p207_p3), 0  }
   0x9   : > { %s771_s24 = smov (%p29_p4, %s769_s24), 0  ;;  %210 = sbr.rel (%p207_p3) target bundleno = 461 (0x1cd), region = 40 }
   0xa   : > { %552 = vmatprep.mubr.msk.f32.mxu0 (!%p207_p3), %vm271_vm0, %v257_v0  ;;  %603 = vset.pattern.permute.xlu0 (!%p207_p3), %v645_v2  ;;  %v259_v3 = vld [vmem:[%s758_s2] sm:$0xff] (!%p207_p3)  ;;  %vm278_vm1 = vcmask (!%p207_p3), 1043456   ;;  %v258_v5 = vld [vmem:[%s757_s1 + $0x8] sm:$0xff] (!%p207_p3)  ;;  %v646_v6 = vmov (!%p207_p3), 0.0   ;;  %vm647_vm2 = vmmov (!%p207_p3), 0   ;;  %vm368_vm4 = vcmask (!%p207_p3), 64512  }
   0xb   : > { %604 = vset.pattern.permute.xlu1 (!%p207_p3), %v645_v2  ;;  %268 = vperm.xlu0 (!%p207_p3), %603, %v260_v1   ;;  %v362_v7 = vld [vmem:[%s760_s4] sm:$0xf] (!%p207_p3) }
   0xc   : > { %555 = vmatprep.subr.mxu1 (!%p207_p3), %v646_v6  ;;  %557 = vmatprep.mubr.msk.f32.mxu1 (!%p207_p3), %vm647_vm2, %v646_v6  ;;  %v361_v17 = vld [vmem:[%s759_s3] sm:$0xf] (!%p207_p3) }
   0xd   : > { %365 = vperm.xlu1 (!%p207_p3), %604, %v362_v7  }
   0xf   : > { %263 = vperm.xlu0 (!%p207_p3), %603, %v259_v3  }
  0x10   : > { %s773_s19 = smov (!%p240_p5, %s631_s19), 1  ;;  %s775_s18 = smov (!%p242_p6, %s627_s18), 1 }
  0x11   : > { %s535_s29 = sshll.u32 %s773_s19, 1 }
  0x12   : > { %s718_s7 = sadd.s32 %s535_s29, %s775_s18 }
  0x13   : > { %s536_s8 = sshll.u32 %s718_s7, 2 }
  0x14   : > { %s247_s11 = scalar_lea.vmem %s756_s0, %s536_s8  ;;  %s255_s25 = scalar_lea.vmem %s761_s5, %s536_s8 }
  0x15   : > { %v256_v4 = vld [vmem:[%s247_s11] sm:$0xf] }
  0x16   : > { %550 = vmatprep.subr.msk.mxu0 %vm278_vm1, %v256_v4 }
  0x17   : > { %551 = vmatpush3.msk.msra.mxu0 %vm278_vm1, %v256_v4 }
  0x18   : > { %553 = vmatmul.mubr.msk.f32.vlgmr.msra.gmra.mrb[0].mxu0 %vm271_vm0, %v258_v5 }
  0x8a   : > { %v269_v8 = vpop.permute.xlu0 %268 }
  0x8c   : > { %v366_v18 = vpop.permute.xlu1 %365 }
  0x8e   : > { %v264_v12 = vpop.permute.xlu0 %263 }
  0xeb   : > { %v554_v9 = vpop.f32.mrb[0].mxu0 }
  0xec   : > { %v354_v10 = vadd.f32 %v554_v9, %v269_v8  ;;  %v348_v11 = vpop.f32.mrb[1].mxu0 }
  0xed   : > { %v349_v14 = vadd.f32 %v348_v11, %v264_v12 }
  0xee   : > { %v358_v13 = vmul.f32 0.1, %v354_v10  ;;  %vm357_vm3 = vcmp.ge.f32.partialorder %v354_v10, 0.0 }
  0xf0   : > { %v359_v15 = vsel %vm357_vm3, %v354_v10, %v358_v13 }
  0xf1   : > { %v360_v16 = vmul.f32 %v359_v15, %v349_v14 }
  0xf3   : > { %556 = vmatpush3.msra.mxu1 %v360_v16 }
  0xf4   : > { %558 = vmatmul.mubr.msk.f32.vlgmr.msra.gmra.mrb[0].mxu1 %vm368_vm4, %v361_v17 }
 0x1c7   : > { %v438_v19 = vpop.f32.mrb[0].mxu1 }
 0x1c8   : > { %v439_v20 = vadd.f32 %v438_v19, %v366_v18  ;;  %v559_v21 = vpop.f32.mrb[1].mxu1 }
 0x1ca   : > { %v442_v22 = vadd.f32 %v439_v20, %v256_v4 }
 0x1cc   : > { %443 = vst [vmem:[%s255_s25] sm:$0xf] %v442_v22 }
 0x1cd PF: > { %s15_s22 = sadd.s32 1, %s643_s22   ;;  %s762_s18 = smov %s635_s20 }
 0x1ce   : > { %p12_p7 = scmp.ge.s32.totalorder %s15_s22, 6   ;;  %s763_s19 = smov %s639_s21 }
 0x1cf   : > { %s764_s20 = smov %s767_s23  ;;  %s765_s21 = smov %s771_s24 }
 0x1d0   :  { %14 = sbr.rel (!%p12_p7) target bundleno = 3 (0x3), region = 70 }

</bundles_post_ra>
